<compile_context>
chip_gen: v5e
topology: v5e:2x2
jax: 0.10.0
libtpu: 0.0.40
codegen_flags: <defaults>
</compile_context>

<pallas_src>
import math
import functools

import jax
import jax.numpy as jnp
import numpy as np
from jax.experimental import pallas as pl
from jax.experimental.pallas import tpu as pltpu


# Above v5e's 16 MiB default scoped VMEM, comfortably below v7x's 64 MiB physical.
_VMEM_LIMIT_BYTES = 48 * 1024 * 1024


# --------------------------------------------------------------------------
# Tiling helpers
# --------------------------------------------------------------------------
def _choose_row_tile(rows, d, itemsize=4, target_bytes=2 << 20, min_steps=4):
    """Pick a row tile so each (tr, D) block is ~2 MiB, multiple of 8 rows, and
    the grid has at least `min_steps` steps (pipeline overlap / v7x megacore)."""
    if rows <= 8:
        return rows
    tr = max(8, (target_bytes // max(1, d * itemsize)) // 8 * 8)
    cap = max(8, (rows // min_steps) // 8 * 8)
    tr = min(tr, cap, rows)
    return max(8, (tr // 8) * 8)


def _choose_col_tile(d, max_tile=512):
    """Lane-dense, 128-aligned column tile for the weight's output dim that
    divides D exactly (avoids OOB lane slices of the resident x block)."""
    if d % 128 != 0 or d <= max_tile:
        return d
    for cand in range(max_tile, 127, -128):
        if d % cand == 0:
            return cand
    return 128


# --------------------------------------------------------------------------
# Kernels
# --------------------------------------------------------------------------
def _layernorm_kernel(x_ref, g_ref, b_ref, o_ref, *, eps):
    """Row-wise LayerNorm with PyTorch `x.std()` (Bessel-corrected) semantics.
    Single pass: sum and sum-of-squares, then reciprocal-multiply normalize."""
    x = x_ref[...].astype(jnp.float32)                     # (TR, D)
    d = x.shape[-1]
    s1 = jnp.sum(x, axis=-1, keepdims=True)
    s2 = jnp.sum(x * x, axis=-1, keepdims=True)
    mean = s1 * (1.0 / d)
    var = jnp.maximum((s2 - s1 * mean) * (1.0 / (d - 1)), 0.0)
    std = jnp.sqrt(var)
    inv = pl.reciprocal(std + eps, approx=False)           # mem-bound: keep exact
    y = g_ref[...].astype(jnp.float32) * ((x - mean) * inv) + b_ref[...].astype(jnp.float32)
    o_ref[...] = y.astype(o_ref.dtype)


def _residual_add_kernel(x_ref, z_ref, o_ref):
    """out = x + z  (dropout is identity in eval mode)."""
    o_ref[...] = x_ref[...] + z_ref[...]


def _fused_ln_linear_residual_kernel(x_ref, g_ref, b_ref, w_ref, wb_ref, o_ref,
                                     y_scratch, *, eps, tn):
    """Fused SublayerConnection for a position-wise Linear sublayer:
         out = x + (LayerNorm(x) @ W + b)
    Grid = (row tiles, weight-column tiles). LayerNorm is computed once per row
    tile (j == 0) into a bf16 scratch that feeds the MXU for every column tile."""
    j = pl.program_id(1)

    @pl.when(j == 0)
    def _():
        x = x_ref[...].astype(jnp.float32)                 # (TR, D)
        d = x.shape[-1]
        s1 = jnp.sum(x, axis=-1, keepdims=True)
        s2 = jnp.sum(x * x, axis=-1, keepdims=True)
        mean = s1 * (1.0 / d)
        var = jnp.maximum((s2 - s1 * mean) * (1.0 / (d - 1)), 0.0)
        inv = pl.reciprocal(jnp.sqrt(var) + eps, approx=True)   # EUP slot
        y = g_ref[...].astype(jnp.float32) * ((x - mean) * inv) \
            + b_ref[...].astype(jnp.float32)
        y_scratch[...] = y.astype(y_scratch.dtype)         # bf16 MXU feed

    # MXU matmul: bf16 x bf16 -> f32 accumulate.
    z = jnp.dot(y_scratch[...], w_ref[...], preferred_element_type=jnp.float32)
    z = z + wb_ref[...].astype(jnp.float32)

    col0 = j * tn
    if tn % 128 == 0:
        col0 = pl.multiple_of(col0, 128)
    x_tile = x_ref[:, pl.ds(col0, tn)].astype(jnp.float32)
    o_ref[...] = (x_tile + z).astype(o_ref.dtype)


# --------------------------------------------------------------------------
# Wrappers
# --------------------------------------------------------------------------
def layernorm_pallas(x, a2, b2, *, eps=1e-6):
    """LayerNorm(x) with the module's semantics, tiled over flattened rows."""
    d = x.shape[-1]
    x2 = x.reshape(-1, d)
    rows = x2.shape[0]
    tr = _choose_row_tile(rows, d)

    out = pl.pallas_call(
        functools.partial(_layernorm_kernel, eps=eps),
        out_shape=jax.ShapeDtypeStruct((rows, d), x.dtype),
        grid=(pl.cdiv(rows, tr),),
        in_specs=[
            pl.BlockSpec((tr, d), lambda i: (i, 0)),
            pl.BlockSpec((1, d), lambda i: (0, 0)),
            pl.BlockSpec((1, d), lambda i: (0, 0)),
        ],
        out_specs=pl.BlockSpec((tr, d), lambda i: (i, 0)),
        compiler_params=pltpu.CompilerParams(
            dimension_semantics=("parallel",),
            vmem_limit_bytes=_VMEM_LIMIT_BYTES),
    )(x2, a2.reshape(1, d), b2.reshape(1, d))
    return out.reshape(x.shape)


def residual_add_pallas(x, z):
    """x + z, tiled over flattened rows."""
    d = x.shape[-1]
    x2 = x.reshape(-1, d)
    z2 = z.reshape(-1, d)
    rows = x2.shape[0]
    tr = _choose_row_tile(rows, d)

    out = pl.pallas_call(
        _residual_add_kernel,
        out_shape=jax.ShapeDtypeStruct((rows, d), x.dtype),
        grid=(pl.cdiv(rows, tr),),
        in_specs=[
            pl.BlockSpec((tr, d), lambda i: (i, 0)),
            pl.BlockSpec((tr, d), lambda i: (i, 0)),
        ],
        out_specs=pl.BlockSpec((tr, d), lambda i: (i, 0)),
        compiler_params=pltpu.CompilerParams(
            dimension_semantics=("parallel",),
            vmem_limit_bytes=_VMEM_LIMIT_BYTES),
    )(x2, z2)
    return out.reshape(x.shape)


def sublayer_connection_pallas(x, sublayer_fn, a2, b2, *, eps=1e-6):
    """Generic path:  x + sublayer(LayerNorm(x)).

    `sublayer_fn` is an arbitrary JAX callable (the PyTorch module takes the
    sublayer as an argument). Prefer `sublayer_connection_linear_fused` when the
    sublayer is a position-wise Linear — it keeps the activation in VMEM instead
    of streaming it through HBM 5-6x."""
    y = layernorm_pallas(x, a2, b2, eps=eps)
    z = sublayer_fn(y)                       # dropout == identity (eval mode)
    return residual_add_pallas(x, z)


def sublayer_connection_linear_fused(x, a2, b2, w, wb, *, eps=1e-6, col_tile=512):
    """Fused path for a position-wise Linear sublayer:
       out = x + (LayerNorm(x) @ w + wb)  in a single Pallas kernel.
    The weight is streamed as bf16 (D, tn) column tiles, so VMEM does not scale
    with D^2 and the MXU runs in its native dtype."""
    d = x.shape[-1]
    assert w.shape == (d, d), "fused path assumes a square position-wise Linear(D, D)"
    x2 = x.reshape(-1, d)
    rows = x2.shape[0]

    tr = _choose_row_tile(rows, d)
    tn = _choose_col_tile(d, col_tile)
    grid = (pl.cdiv(rows, tr), pl.cdiv(d, tn))

    w_bf16 = w.astype(jnp.bfloat16)          # MXU-native dtype; halves weight VMEM

    out = pl.pallas_call(
        functools.partial(_fused_ln_linear_residual_kernel, eps=eps, tn=tn),
        out_shape=jax.ShapeDtypeStruct((rows, d), x.dtype),
        grid=grid,
        in_specs=[
            pl.BlockSpec((tr, d), lambda i, j: (i, 0)),    # x rows (resident over j)
            pl.BlockSpec((1, d), lambda i, j: (0, 0)),     # a_2 (grid-invariant)
            pl.BlockSpec((1, d), lambda i, j: (0, 0)),     # b_2 (grid-invariant)
            pl.BlockSpec((d, tn), lambda i, j: (0, j)),    # W column tile (bf16)
            pl.BlockSpec((1, tn), lambda i, j: (0, j)),    # Linear bias tile
        ],
        out_specs=pl.BlockSpec((tr, tn), lambda i, j: (i, j)),
        scratch_shapes=[pltpu.VMEM((tr, d), jnp.bfloat16)],   # normalized activations
        compiler_params=pltpu.CompilerParams(
            dimension_semantics=("parallel", "arbitrary"),
            vmem_limit_bytes=_VMEM_LIMIT_BYTES),
    )(x2, a2.reshape(1, d), b2.reshape(1, d), w_bf16, wb.reshape(1, d))
    return out.reshape(x.shape)


# --------------------------------------------------------------------------
# Pure-JAX reference (matches the PyTorch forward in eval mode)
# --------------------------------------------------------------------------
def reference_forward(x, sublayer_fn, a2, b2, eps):
    mean = jnp.mean(x, axis=-1, keepdims=True)
    std = jnp.std(x, axis=-1, keepdims=True, ddof=1)       # torch.Tensor.std (unbiased)
    y = a2 * (x - mean) / (std + eps) + b2
    return x + sublayer_fn(y)                              # dropout = identity


# --------------------------------------------------------------------------
# Demo / self-test
# --------------------------------------------------------------------------
if __name__ == "__main__":
    B, S, D = 2, 128, 128        # D multiple of 128 -> lane-dense blocks
    eps = 1e-6

    root = jax.random.PRNGKey(0)
    kx, ka, kb, kw, kwb = jax.random.split(root, 5)

    x = jax.random.normal(kx, (B, S, D), jnp.float32)

    # LayerNorm parameters (module inits to ones/zeros; perturb for a non-trivial test)
    a2 = 1.0 + 0.1 * jax.random.normal(ka, (D,), jnp.float32)
    b2 = 0.1 * jax.random.normal(kb, (D,), jnp.float32)

    # Example sublayer: position-wise Linear(D, D)
    W = jax.random.normal(kw, (D, D), jnp.float32) / math.sqrt(D)
    wb = 0.1 * jax.random.normal(kwb, (D,), jnp.float32)

    def sublayer_fn(y):
        return y @ W + wb

    # Generic path (LayerNorm kernel -> JAX sublayer -> residual-add kernel)
    out_generic = jax.block_until_ready(
        sublayer_connection_pallas(x, sublayer_fn, a2, b2, eps=eps))

    # Fused path (single kernel: LayerNorm + bf16 Linear + residual)
    out_fused = jax.block_until_ready(
        sublayer_connection_linear_fused(x, a2, b2, W, wb, eps=eps))

    ref = reference_forward(x, sublayer_fn, a2, b2, eps)

    # Generic path is f32 end to end.
    np.testing.assert_allclose(np.asarray(out_generic), np.asarray(ref),
                               rtol=1e-3, atol=1e-3)
    # Fused path feeds the MXU in bf16 (and uses the approx EUP reciprocal),
    # so the tolerance is looser.
    np.testing.assert_allclose(np.asarray(out_fused), np.asarray(ref),
                               rtol=5e-2, atol=5e-2)

    print("KERNEL_OK")
</pallas_src>

<mosaic_0001>
module attributes {stable_mosaic.version = 11 : i64} {
  func.func @_layernorm_kernel(%arg0: i32, %arg1: memref<64x128xf32, #tpu.memory_space<vmem>>, %arg2: memref<1x128xf32, #tpu.memory_space<vmem>>, %arg3: memref<1x128xf32, #tpu.memory_space<vmem>>, %arg4: memref<64x128xf32, #tpu.memory_space<vmem>>) attributes {dimension_semantics = [#tpu.dimension_semantics<parallel>], iteration_bounds = array<i64: 4>, scalar_prefetch = 0 : i64, scratch_operands = 0 : i64, tpu.core_type = #tpu.core_type<tc>, window_params = [{transform_indices = @transform_0, window_bounds = array<i64: 64, 128>}, {pipeline_mode = #tpu.pipeline_mode<synchronous>, transform_indices = @transform_1, window_bounds = array<i64: 1, 128>}, {pipeline_mode = #tpu.pipeline_mode<synchronous>, transform_indices = @transform_2, window_bounds = array<i64: 1, 128>}, {transform_indices = @transform_3, window_bounds = array<i64: 64, 128>}]} {
    %c0 = arith.constant 0 : index
    %c0_0 = arith.constant 0 : index
    %0 = vector.load %arg1[%c0, %c0_0] : memref<64x128xf32, #tpu.memory_space<vmem>>, vector<64x128xf32>
    %cst = arith.constant dense<0.000000e+00> : vector<64xf32>
    %1 = vector.multi_reduction <add>, %0, %cst [1] : vector<64x128xf32> to vector<64xf32>
    %2 = vector.shape_cast %1 : vector<64xf32> to vector<64x1xf32>
    %3 = arith.mulf %0, %0 : vector<64x128xf32>
    %cst_1 = arith.constant dense<0.000000e+00> : vector<64xf32>
    %4 = vector.multi_reduction <add>, %3, %cst_1 [1] : vector<64x128xf32> to vector<64xf32>
    %5 = vector.shape_cast %4 : vector<64xf32> to vector<64x1xf32>
    %cst_2 = arith.constant 7.812500e-03 : f32
    %6 = vector.broadcast %cst_2 : f32 to vector<64x1xf32>
    %7 = arith.mulf %2, %6 : vector<64x1xf32>
    %8 = arith.mulf %2, %7 : vector<64x1xf32>
    %9 = arith.subf %5, %8 : vector<64x1xf32>
    %cst_3 = arith.constant 0.00787401571 : f32
    %10 = vector.broadcast %cst_3 : f32 to vector<64x1xf32>
    %11 = arith.mulf %9, %10 : vector<64x1xf32>
    %cst_4 = arith.constant 0.000000e+00 : f32
    %12 = vector.broadcast %cst_4 : f32 to vector<64x1xf32>
    %13 = arith.maximumf %11, %12 : vector<64x1xf32>
    %14 = math.sqrt %13 : vector<64x1xf32>
    %cst_5 = arith.constant 9.99999997E-7 : f32
    %15 = vector.broadcast %cst_5 : f32 to vector<64x1xf32>
    %16 = arith.addf %14, %15 : vector<64x1xf32>
    %17 = tpu.reciprocal %16 : vector<64x1xf32> -> vector<64x1xf32>
    %c0_6 = arith.constant 0 : index
    %c0_7 = arith.constant 0 : index
    %18 = vector.load %arg2[%c0_6, %c0_7] : memref<1x128xf32, #tpu.memory_space<vmem>>, vector<1x128xf32>
    %19 = vector.broadcast %7 : vector<64x1xf32> to vector<64x128xf32>
    %20 = arith.subf %0, %19 : vector<64x128xf32>
    %21 = vector.broadcast %17 : vector<64x1xf32> to vector<64x128xf32>
    %22 = arith.mulf %20, %21 : vector<64x128xf32>
    %23 = vector.broadcast %18 : vector<1x128xf32> to vector<64x128xf32>
    %24 = arith.mulf %23, %22 : vector<64x128xf32>
    %c0_8 = arith.constant 0 : index
    %c0_9 = arith.constant 0 : index
    %25 = vector.load %arg3[%c0_8, %c0_9] : memref<1x128xf32, #tpu.memory_space<vmem>>, vector<1x128xf32>
    %26 = vector.broadcast %25 : vector<1x128xf32> to vector<64x128xf32>
    %27 = arith.addf %24, %26 : vector<64x128xf32>
    %c0_10 = arith.constant 0 : index
    %c0_11 = arith.constant 0 : index
    %28 = vector.load %arg4[%c0_10, %c0_11] : memref<64x128xf32, #tpu.memory_space<vmem>>, vector<64x128xf32>
    tpu.vector_store %arg4[%c0_10, %c0_11], %27 {strides = array<i32>} : memref<64x128xf32, #tpu.memory_space<vmem>>, vector<64x128xf32>,
    return
  }
  func.func @transform_0(%arg0: i32) -> (i32, i32) {
    %c0_i32 = arith.constant 0 : i32
    %c0_i32_0 = arith.constant 0 : i32
    return %arg0, %c0_i32 : i32, i32
  }
  func.func @transform_1(%arg0: i32) -> (i32, i32) {
    %c0_i32 = arith.constant 0 : i32
    %c0_i32_0 = arith.constant 0 : i32
    %c0_i32_1 = arith.constant 0 : i32
    return %c0_i32, %c0_i32_0 : i32, i32
  }
  func.func @transform_2(%arg0: i32) -> (i32, i32) {
    %c0_i32 = arith.constant 0 : i32
    %c0_i32_0 = arith.constant 0 : i32
    %c0_i32_1 = arith.constant 0 : i32
    return %c0_i32, %c0_i32_0 : i32, i32
  }
  func.func @transform_3(%arg0: i32) -> (i32, i32) {
    %c0_i32 = arith.constant 0 : i32
    %c0_i32_0 = arith.constant 0 : i32
    return %arg0, %c0_i32 : i32, i32
  }
}

</mosaic_0001>

<bundles_post_ra>
// kernel: tpu_custom_call.1
= control target key start
LH: loop header
LB: loop body
LE: loop exit
PB: predicated region body
PF: predicated region fallthrough
CT: control target
= control target key end

     0   :  { %8 = vsyncpa [#allocation3], 0  ;;  %s1386_s0 = inlined_call_operand.hbm [shape: f32[256,128], index: 0, kind: input, shape index: {}]   ;;  %s1387_s1 = inlined_call_operand.hbm [shape: f32[1,128], index: 1, kind: input, shape index: {}]   ;;  %s1388_s2 = inlined_call_operand.vmem [shape: f32[1,128], index: 2, kind: input, shape index: {}]   ;;  %s1389_s3 = inlined_call_operand.hbm [shape: f32[256,128], index: 3, kind: output, shape index: {}]  }
   0x1   :  { %10 = vsyncpa [#allocation3 + $0x1], 0 }
   0x2   :  { %11 = vsyncpa [#allocation6], 0 }
   0x3   :  { %12 = vsyncpa [#allocation4], 0 }
   0x4   :  { %14 = vsyncpa [#allocation4 + $0x1], 0  ;;  %s929_s12 = smov 0   ;;  %s931_s13 = smov 0  }
   0x5   :  { %s933_s14 = smov 0   ;;  %s935_s15 = smov 0  }
   0x6 LB: > { %s950_s16 = sadd.s32 4294967295, %s902_s15   ;;  %s659_s17 = sadd.s32 4294967294, %s902_s15   ;;  %s902_s15 = sphi %s935_s15, %s1405_s15   ;;  %s898_s14 = sphi %s933_s14, %s1404_s14   ;;  %s894_s13 = sphi %s931_s13, %s1403_s13   ;;  %s890_s12 = sphi %s929_s12, %s1402_s12  }
   0x7   : > { %s954_s18 = sadd.s32 1, %s902_s15   ;;  %s27_s19 = sadd.s32 1, %s898_s14 }
   0x8   : > { %s24_s20 = ssub.s32 %s902_s15, %s954_s18  ;;  %p34_p0 = scmp.ne.s32.totalorder %s898_s14, %s894_s13 }
   0x9   : > { %p25_p1 = scmp.eq.s32.totalorder %s24_s20, 0  ;;  %p35_p2 = scmp.eq.s32.totalorder %s902_s15, 0 }
   0xa   : > { %p40_p3 = scmp.ne.s32.totalorder %s894_s13, %s890_s12  ;;  %p41_p4 = scmp.eq.s32.totalorder %s950_s16, 0 }
   0xb   : > { %s966_s21 = scalar_select %p25_p1, %s898_s14, %s27_s19  }
   0xc   : > { %p968_p5 = por %p35_p2, %p34_p0  ;;  %p974_p6 = por %p41_p4, %p40_p3 }
   0xd   : > { %p106_p7 = scmp.eq.s32.totalorder %s950_s16, 3  ;;  %p112_p8 = scmp.eq.s32.totalorder %s659_s17, 3 }
   0xe   : > { %p660_p9 = scmp.ge.s32.totalorder %s902_s15, 1  ;;  %p119_p10 = scmp.lt.s32.totalorder %s902_s15, 5 }
   0xf   : > { %p981_p11 = por %p106_p7, %p34_p0  ;;  %p985_p12 = por %p112_p8, %p40_p3 }
  0x10   : > { %p989_p13 = pnand %p660_p9, %p119_p10  ;;  %s131_s29 = sshll.u32 %s1387_s1, 4  ;;  %s132_s29 = int_to_ptr.hbm [resolvable:$true] %s131_s29 }
  0x11   : > { %s904_s30 = smov [#allocation5]   ;;  %p698_p2 = scmp.lt.s32.totalorder %s902_s15, 4 }
  0x12   : > { %p685_p1 = pneg %p989_p13  ;;  %s133_s4 = sshll.u32 %s904_s30, 4  ;;  %s134_s4 = int_to_ptr.vmem [resolvable:$true] %s133_s4 }
  0x13   : > { %s147_s5 = sand.u32 1, %s898_s14   ;;  %p1004_p3 = pnand %p698_p2, %p968_p5 }
  0x14   : > { %p686_p0 = pnand %p685_p1, %p41_p4  ;;  %s663_s7 = sshll.u32 %s147_s5, 6 }
  0x15   : > { %s675_s8 = sshll.u32 %s902_s15, 6  ;;  %s151_s19 = scalar_lea.vmem [#allocation2], %s663_s7 }
  0x16   : > { %688 = dma.hbm_to_vmem [thread:$0]  (!%p686_p0), %s132_s29, 16, %s134_s4, [#allocation6]  }
  0x17   : > { %s156_s11 = scalar_lea.hbm %s1386_s0, %s675_s8  ;;  %s159_s20 = sshll.u32 %s151_s19, 4  ;;  %s160_s20 = int_to_ptr.vmem [resolvable:$true] %s159_s20 }
  0x18   : > { %s157_s17 = sshll.u32 %s156_s11, 4  ;;  %s148_s27 = scalar_lea.sflag [#allocation3], %s147_s5  ;;  %s158_s17 = int_to_ptr.hbm [resolvable:$true] %s157_s17 }
  0x19   : > { %s802_s28 = sshra.s32 %s158_s17, 4  ;;  %p806_p7 = pneg %p1004_p3  ;;  %s803_s28 = int_to_ptr.hbm [resolvable:$true] %s802_s28 }
  0x1a   : > { %s804_s22 = scalar_lea.hbm %s803_s28, 64  ;;  %s809_s4 = scalar_lea.hbm %s1386_s0, 256 }
  0x1b   : > { %p805_p5 = scmp.ne.s32.totalorder %s803_s28, %s804_s22  ;;  %p810_p10 = scmp.lt.s32.totalorder %s803_s28, %s1386_s0 }
  0x1c   : > { %p811_p1 = scmp.lt.s32.totalorder %s809_s4, %s804_s22 }
  0x1d   : > { %p807_p8 = pnand %p806_p7, %p805_p5 }
  0x1e   : > { %p812_p0 = por %p811_p1, %p810_p10 }
  0x1f   : > { %p808_p9 = pneg %p807_p8 }
  0x21   : > { %p813_p2 = pnand %p812_p0, %p808_p9 }
  0x23   : > { %816 = shalt.err (!%p813_p2)
}
  0x24   : > { %s905_s5 = smov 128   ;;  %s906_s7 = smov 8  }
  0x25   : > { %692 = dma.hbm_to_vmem [thread:$0]  (!%p1004_p3), %s158_s17, 1024, %s160_s20, %s148_s27, %s905_s5, %s905_s5, %s906_s7  }
  0x26   : > { %171 = sbr.rel (%p989_p13) target bundleno = 283 (0x11b), region = 32  ;;  %s1025_s10 = sand.u32 (!%p989_p13), 1, %s894_s13  }
  0x27   : > { %s667_s11 = sshll.u32 (!%p989_p13), %s1025_s10, 6  ;;  %s174_s19 = scalar_lea.sflag (!%p989_p13), [#allocation3], %s1025_s10 }
  0x28   : > { %s177_s28 = scalar_lea.vmem (!%p989_p13), [#allocation2], %s667_s11 }
  0x2b   : > { %877 = dma.done.wait (%p974_p6), %s174_s19, 1024  }
  0x2c   : > { %879 = vsyncadd (%p974_p6), %s174_s19, 4294966272 }
  0x2d   : > { %881 = dma.done.wait (%p41_p4), [#allocation6], 16  }
  0x2e   : > { %883 = vsyncadd (%p41_p4), [#allocation6], 4294967280  ;;  %v1039_v0 = vld [vmem:[%s177_s28 + $0x20] sm:$0xff]  ;;  %v1041_v1 = vld [vmem:[%s177_s28 + $0x10] sm:$0xff]  ;;  %s1271_s6 = scalar_lea.vmem [#allocation7], %s667_s11  ;;  %s676_s17 = sshll.u32 %s950_s16, 6 }
  0x2f   : > { %v1043_v2 = vld [vmem:[%s177_s28] sm:$0xff]  ;;  %224 = vadd.xlane.f32.xlu2 %v1039_v0  ;;  %220 = vadd.xlane.f32.xlu1 %v1041_v1  ;;  %v1048_v3 = vld [vmem:[%s177_s28 + $0x28] sm:$0xff]  ;;  %v1050_v4 = vld [vmem:[%s177_s28 + $0x18] sm:$0xff]  ;;  %v234_v9 = vmul.f32 %v1041_v1, %v1041_v1  ;;  %v236_v14 = vmul.f32 %v1039_v0, %v1039_v0  ;;  %s572_s22 = scalar_lea.hbm %s1389_s3, %s676_s17  ;;  %s573_s29 = sshll.u32 %s1271_s6, 4  ;;  %s574_s29 = int_to_ptr.vmem [resolvable:$true] %s573_s29 }
  0x30   : > { %216 = vadd.xlane.f32.xlu0 %v1043_v2  ;;  %v1052_v5 = vld [vmem:[%s177_s28 + $0x8] sm:$0xff]  ;;  %v232_v6 = vmul.f32 %v1043_v2, %v1043_v2  ;;  %v1059_v7 = vld [vmem:[%s177_s28 + $0x38] sm:$0xff]  ;;  %v1061_v8 = vld [vmem:[%s177_s28 + $0x30] sm:$0xff]  ;;  %v235_v10 = vmul.f32 %v1050_v4, %v1050_v4  ;;  %v237_v12 = vmul.f32 %v1048_v3, %v1048_v3  ;;  %s575_s16 = sshll.u32 %s572_s22, 4  ;;  %s561_s30 = scalar_lea.sflag [#allocation4], %s1025_s10  ;;  %s576_s16 = int_to_ptr.hbm [resolvable:$true] %s575_s16 }
  0x31   : > { %v233_v11 = vmul.f32 %v1052_v5, %v1052_v5  ;;  %v238_v13 = vmul.f32 %v1061_v8, %v1061_v8  ;;  %v239_v15 = vmul.f32 %v1059_v7, %v1059_v7  ;;  %s846_s4 = sshra.s32 %s576_s16, 4  ;;  %s852_s7 = scalar_lea.hbm %s1389_s3, 256  ;;  %s847_s4 = int_to_ptr.hbm [resolvable:$true] %s846_s4 }
  0x32   : > { %s848_s9 = scalar_lea.hbm %s847_s4, 64  ;;  %p853_p3 = scmp.lt.s32.totalorder %s847_s4, %s1389_s3 }
  0x33   : > { %p849_p4 = scmp.ne.s32.totalorder %s847_s4, %s848_s9  ;;  %p854_p5 = scmp.lt.s32.totalorder %s852_s7, %s848_s9 }
  0x35   : > { %p850_p6 = pnand %p849_p4, %p981_p11  ;;  %p855_p7 = por %p854_p5, %p853_p3 }
  0x37   : > { %226 = vadd.xlane.f32.xlu2 %v1048_v3  ;;  %222 = vadd.xlane.f32.xlu1 %v1050_v4  ;;  %p851_p13 = pneg %p850_p6 }
  0x38   : > { %218 = vadd.xlane.f32.xlu0 %v1052_v5 }
  0x39   : > { %p856_p8 = pnand %p855_p7, %p851_p13 }
  0x3f   : > { %230 = vadd.xlane.f32.xlu1 %v1059_v7  ;;  %240 = vadd.xlane.f32.xlu2 %v232_v6 }
  0x40   : > { %228 = vadd.xlane.f32.xlu0 %v1061_v8 }
  0x47   : > { %244 = vadd.xlane.f32.xlu1 %v234_v9  ;;  %246 = vadd.xlane.f32.xlu2 %v235_v10 }
  0x48   : > { %242 = vadd.xlane.f32.xlu0 %v233_v11 }
  0x4f   : > { %250 = vadd.xlane.f32.xlu1 %v237_v12  ;;  %252 = vadd.xlane.f32.xlu2 %v238_v13 }
  0x50   : > { %248 = vadd.xlane.f32.xlu0 %v236_v14 }
  0x58   : > { %254 = vadd.xlane.f32.xlu0 %v239_v15 }
  0xa2   : > { %v225_v16 = vpop.xlane.xlu2 %224  ;;  %v221_v17 = vpop.xlane.xlu1 %220 }
  0xa3   : > { %v217_v18 = vpop.xlane.xlu0 %216  ;;  %v1084_v28 = vmul.f32 0.0078125, %v221_v17  ;;  %v1096_v44 = vmul.f32 0.0078125, %v225_v16 }
  0xa4   : > { %v1079_v22 = vmul.f32 0.0078125, %v217_v18 }
  0xa5   : > { %v266_v33 = vmul.f32 %v1084_v28, %v221_v17  ;;  %v268_v53 = vmul.f32 %v1096_v44, %v225_v16 }
  0xa6   : > { %v264_v23 = vmul.f32 %v1079_v22, %v217_v18 }
  0xaa   : > { %v227_v19 = vpop.xlane.xlu2 %226  ;;  %v223_v20 = vpop.xlane.xlu1 %222 }
  0xab   : > { %v219_v21 = vpop.xlane.xlu0 %218  ;;  %v1086_v29 = vmul.f32 0.0078125, %v223_v20  ;;  %v1098_v45 = vmul.f32 0.0078125, %v227_v19 }
  0xac   : > { %v1088_v31 = vmul.f32 0.0078125, %v219_v21 }
  0xad   : > { %v267_v34 = vmul.f32 %v1086_v29, %v223_v20  ;;  %v269_v54 = vmul.f32 %v1098_v45, %v227_v19 }
  0xae   : > { %v265_v35 = vmul.f32 %v1088_v31, %v219_v21 }
  0xb2   : > { %v1082_v24 = vpop.xlane.xlu1 %230  ;;  %v241_v25 = vpop.xlane.xlu2 %240 }
  0xb3   : > { %v229_v26 = vpop.xlane.xlu0 %228  ;;  %v272_v27 = vsub.f32 %v241_v25, %v264_v23  ;;  %v1121_v19 = vmul.f32 0.0078125, %v1082_v24 }
  0xb4   : > { %v1100_v48 = vmul.f32 0.0078125, %v229_v26 }
  0xb5   : > { %v280_v30 = vmul.f32 0.007874016, %v272_v27 }
  0xb6   : > { %v270_v58 = vmul.f32 %v1100_v48, %v229_v26 }
  0xb7   : > { %v1090_v32 = vmax.f32 %v280_v30, 0.0 }
  0xb9   : > { %740 = vrsqrt.f32 %v1090_v32  ;;  %vm303_vm0 = vcmp.eq.f32.partialorder %v1090_v32, inf  ;;  %vm305_vm1 = vcmp.eq.f32.partialorder %v1090_v32, 0.0  ;;  %v306_v26 = vand.u32 2147483648, %v1090_v32 }
  0xba   : > { %v245_v36 = vpop.xlane.xlu1 %244  ;;  %v247_v37 = vpop.xlane.xlu2 %246 }
  0xbb   : > { %v274_v38 = vsub.f32 %v245_v36, %v266_v33  ;;  %v243_v39 = vpop.xlane.xlu0 %242  ;;  %v275_v40 = vsub.f32 %v247_v37, %v267_v34  ;;  %v515_v36 = vsub.f32 %v1041_v1, %v1084_v28 }
  0xbc   : > { %v273_v41 = vsub.f32 %v243_v39, %v265_v35  ;;  %v513_v39 = vsub.f32 %v1043_v2, %v1079_v22 }
  0xbd   : > { %v282_v42 = vmul.f32 0.007874016, %v274_v38  ;;  %v283_v43 = vmul.f32 0.007874016, %v275_v40 }
  0xbe   : > { %v281_v46 = vmul.f32 0.007874016, %v273_v41 }
  0xbf   : > { %v741_v47 = vpop.eup %740  ;;  %v1102_v49 = vmax.f32 %v282_v42, 0.0  ;;  %v1104_v50 = vmax.f32 %v283_v43, 0.0  ;;  %v516_v43 = vsub.f32 %v1050_v4, %v1086_v29  ;;  %v518_v4 = vsub.f32 %v1048_v3, %v1098_v45 }
  0xc0   : > { %v297_v51 = vmul.f32 %v741_v47, %v1090_v32  ;;  %v1107_v52 = vmax.f32 %v281_v46, 0.0 }
  0xc1   : > { %742 = vrsqrt.f32 %v1102_v49  ;;  %vm327_vm2 = vcmp.eq.f32.partialorder %v1102_v49, inf  ;;  %vm329_vm3 = vcmp.eq.f32.partialorder %v1102_v49, 0.0  ;;  %vm339_vm6 = vcmp.eq.f32.partialorder %v1104_v50, inf }
  0xc2   : > { %v298_v55 = vmul.f32 %v741_v47, %v297_v51  ;;  %744 = vrsqrt.f32 %v1107_v52  ;;  %v251_v56 = vpop.xlane.xlu1 %250  ;;  %v253_v57 = vpop.xlane.xlu2 %252  ;;  %v1147_v51 = vmul.f32 %v1121_v19, %v1082_v24  ;;  %vm315_vm4 = vcmp.eq.f32.partialorder %v1107_v52, inf }
  0xc3   : > { %746 = vrsqrt.f32 %v1104_v50  ;;  %v249_v59 = vpop.xlane.xlu0 %248  ;;  %v277_v61 = vsub.f32 %v251_v56, %v269_v54  ;;  %v278_v63 = vsub.f32 %v253_v57, %v270_v58  ;;  %v330_v58 = vand.u32 2147483648, %v1102_v49 }
  0xc4   : > { %v299_v60 = vmul.f32 0.5, %v298_v55  ;;  %v276_v62 = vsub.f32 %v249_v59, %v268_v53  ;;  %vm317_vm5 = vcmp.eq.f32.partialorder %v1107_v52, 0.0  ;;  %v318_v24 = vand.u32 2147483648, %v1107_v52 }
  0xc5   : > { %v285_v9 = vmul.f32 0.007874016, %v277_v61  ;;  %v286_v12 = vmul.f32 0.007874016, %v278_v63  ;;  %vm341_vm7 = vcmp.eq.f32.partialorder %v1104_v50, 0.0  ;;  %v342_v63 = vand.u32 2147483648, %v1104_v50 }
  0xc6   : > { %v300_v6 = vsub.f32 1.5, %v299_v60  ;;  %v284_v10 = vmul.f32 0.007874016, %v276_v62 }
  0xc7   : > { %v743_v11 = vpop.eup %742  ;;  %v1116_v16 = vmax.f32 %v285_v9, 0.0  ;;  %v1130_v30 = vmax.f32 %v286_v12, 0.0 }
  0xc8   : > { %v745_v13 = vpop.eup %744  ;;  %v301_v14 = vmul.f32 %v741_v47, %v300_v6  ;;  %v321_v15 = vmul.f32 %v743_v11, %v1102_v49  ;;  %v1118_v17 = vmax.f32 %v284_v10, 0.0 }
  0xc9   : > { %v747_v18 = vpop.eup %746  ;;  %v309_v20 = vmul.f32 %v745_v13, %v1107_v52  ;;  %748 = vrsqrt.f32 %v1116_v16  ;;  %vm363_vm8 = vcmp.eq.f32.partialorder %v1116_v16, inf  ;;  %vm365_vm10 = vcmp.eq.f32.partialorder %v1116_v16, 0.0 }
  0xca   : > { %v302_v21 = vmul.f32 %v301_v14, %v1090_v32  ;;  %v322_v23 = vmul.f32 %v743_v11, %v321_v15  ;;  %v333_v25 = vmul.f32 %v747_v18, %v1104_v50  ;;  %750 = vrsqrt.f32 %v1118_v17 }
  0xcb   : > { %v310_v27 = vmul.f32 %v745_v13, %v309_v20  ;;  %752 = vrsqrt.f32 %v1130_v30  ;;  %vm351_vm13 = vcmp.eq.f32.partialorder %v1118_v17, inf }
  0xcc   : > { %v304_v33 = vsel %vm303_vm0, %v1090_v32, %v302_v21  ;;  %v323_v34 = vmul.f32 0.5, %v322_v23  ;;  %v334_v35 = vmul.f32 %v747_v18, %v333_v25  ;;  %v514_v32 = vsub.f32 %v1052_v5, %v1088_v31 }
  0xcd   : > { %v307_v37 = vsel %vm305_vm1, %v306_v26, %v304_v33  ;;  %v311_v38 = vmul.f32 0.5, %v310_v27  ;;  %v255_v33 = vpop.xlane.xlu0 %254  ;;  %vm353_vm0 = vcmp.eq.f32.partialorder %v1118_v17, 0.0 }
  0xce   : > { %v1138_v40 = vadd.f32 1e-06, %v307_v37  ;;  %v324_v41 = vsub.f32 1.5, %v323_v34  ;;  %v335_v42 = vmul.f32 0.5, %v334_v35  ;;  %v366_v34 = vand.u32 2147483648, %v1116_v16 }
  0xcf   : > { %v312_v46 = vsub.f32 1.5, %v311_v38  ;;  %v749_v47 = vpop.eup %748  ;;  %v354_v35 = vand.u32 2147483648, %v1118_v17 }
  0xd0   : > { %754 = vrcp.f32 %v1138_v40  ;;  %v325_v53 = vmul.f32 %v743_v11, %v324_v41  ;;  %v336_v55 = vsub.f32 1.5, %v335_v42  ;;  %v357_v56 = vmul.f32 %v749_v47, %v1116_v16  ;;  %v1153_v57 = vpop.eup %750 }
  0xd1   : > { %v313_v54 = vmul.f32 %v745_v13, %v312_v46  ;;  %v345_v6 = vmul.f32 %v1153_v57, %v1118_v17  ;;  %v1166_v9 = vpop.eup %752  ;;  %v409_v25 = vand.u32 2147483647, %v1138_v40  ;;  %vm405_vm9 = vweird.f32 %v1138_v40 }
  0xd2   : > { %v326_v59 = vmul.f32 %v325_v53, %v1102_v49  ;;  %v337_v61 = vmul.f32 %v747_v18, %v336_v55  ;;  %v358_v62 = vmul.f32 %v749_v47, %v357_v56  ;;  %v369_v21 = vmul.f32 %v1166_v9, %v1130_v30 }
  0xd3   : > { %v314_v60 = vmul.f32 %v313_v54, %v1107_v52  ;;  %v346_v20 = vmul.f32 %v1153_v57, %v345_v6  ;;  %v411_v42 = vand.u32 2147483648, %v1138_v40  ;;  %v279_v46 = vsub.f32 %v255_v33, %v1147_v51 }
  0xd4   : > { %v328_v10 = vsel %vm327_vm2, %v1102_v49, %v326_v59  ;;  %v338_v12 = vmul.f32 %v337_v61, %v1104_v50  ;;  %v359_v13 = vmul.f32 0.5, %v358_v62  ;;  %v370_v41 = vmul.f32 %v1166_v9, %v369_v21 }
  0xd5   : > { %v316_v11 = vsel %vm315_vm4, %v1107_v52, %v314_v60  ;;  %v331_v15 = vsel %vm329_vm3, %v330_v58, %v328_v10  ;;  %v347_v38 = vmul.f32 0.5, %v346_v20  ;;  %vm1199_vm12 = vcmp.eq.f32.partialorder %v409_v25, 8.507059e+37  ;;  %v1216_v10 = vld [vmem:[#allocation5] ss:$0 sm:$0xff] }
  0xd6   : > { %v755_v14 = vpop.eup %754  ;;  %v319_v18 = vsel %vm317_vm5, %v318_v24, %v316_v11  ;;  %v1182_v26 = vadd.f32 1e-06, %v331_v15  ;;  %v340_v49 = vsel %vm339_vm6, %v1104_v50, %v338_v12  ;;  %v360_v52 = vsub.f32 1.5, %v359_v13 }
  0xd7   : > { %v401_v23 = vmul.f32 %v755_v14, %v1138_v40  ;;  %v1184_v27 = vadd.f32 1e-06, %v319_v18  ;;  %vm406_vm11 = vweird.f32 %v755_v14  ;;  %v343_v55 = vsel %vm341_vm7, %v342_v63, %v340_v49 }
  0xd8   : > { %756 = vrcp.f32 %v1182_v26  ;;  %v437_v56 = vand.u32 2147483647, %v1182_v26  ;;  %v439_v58 = vand.u32 2147483648, %v1182_v26  ;;  %v1208_v24 = vadd.f32 1e-06, %v343_v55  ;;  %vm407_vm14 = vmor %vm405_vm9, %vm406_vm11 }
  0xd9   : > { %v402_v37 = vsub.f32 1.0, %v401_v23  ;;  %758 = vrcp.f32 %v1184_v27  ;;  %v361_v59 = vmul.f32 %v749_v47, %v360_v52  ;;  %v423_v51 = vand.u32 2147483647, %v1184_v27 }
  0xda   : > { %v348_v61 = vsub.f32 1.5, %v347_v38  ;;  %v371_v62 = vmul.f32 0.5, %v370_v41  ;;  %v412_v6 = vor.u32 1.1754944e-38, %v411_v42  ;;  %vm433_vm15 = vweird.f32 %v1182_v26 }
  0xdb   : > { %v403_v53 = vmul.f32 %v755_v14, %v402_v37  ;;  %760 = vrcp.f32 %v1208_v24  ;;  %v287_v50 = vmul.f32 0.007874016, %v279_v46  ;;  %vm419_vm1 = vweird.f32 %v1184_v27 }
  0xdc   : > { %v362_v11 = vmul.f32 %v361_v59, %v1116_v16  ;;  %v349_v12 = vmul.f32 %v1153_v57, %v348_v61  ;;  %v372_v40 = vsub.f32 1.5, %v371_v62  ;;  %vm1224_vm2 = vcmp.eq.f32.partialorder %v437_v56, 8.507059e+37 }
  0xdd   : > { %v404_v60 = vadd.f32 %v755_v14, %v403_v53  ;;  %v425_v21 = vand.u32 2147483648, %v1184_v27  ;;  %vm375_vm3 = vcmp.eq.f32.partialorder %v1130_v30, inf  ;;  %v440_v23 = vor.u32 1.1754944e-38, %v439_v58 }
  0xde   : > { %v757_v63 = vpop.eup %756  ;;  %vm1239_vm4 = vcmp.eq.f32.partialorder %v423_v51, 8.507059e+37  ;;  %v364_v52 = vsel %vm363_vm8, %v1116_v16, %v362_v11  ;;  %v350_v37 = vmul.f32 %v349_v12, %v1118_v17  ;;  %v373_v38 = vmul.f32 %v1166_v9, %v372_v40 }
  0xdf   : > { %v408_v47 = vsel %vm407_vm14, %v755_v14, %v404_v60  ;;  %v759_v13 = vpop.eup %758  ;;  %v429_v18 = vmul.f32 %v757_v63, %v1182_v26  ;;  %v1233_v14 = vld [vmem:[%s1388_s2] ss:$0 sm:$0xff]  ;;  %vm434_vm5 = vweird.f32 %v757_v63  ;;  %v367_v22 = vsel %vm365_vm10, %v366_v34, %v364_v52 }
  0xe0   : > { %v413_v15 = vsel %vm1199_vm12, %v412_v6, %v408_v47  ;;  %v415_v25 = vmul.f32 %v759_v13, %v1184_v27  ;;  %vm420_vm6 = vweird.f32 %v759_v13  ;;  %v1251_v46 = vadd.f32 1e-06, %v367_v22  ;;  %vm435_vm7 = vmor %vm433_vm15, %vm434_vm5 }
  0xe1   : > { %v521_v57 = vmul.f32 %v513_v39, %v413_v15  ;;  %v430_v49 = vsub.f32 1.0, %v429_v18  ;;  %v761_v39 = vpop.eup %760  ;;  %v352_v53 = vsel %vm351_vm13, %v1118_v17, %v350_v37  ;;  %v374_v56 = vmul.f32 %v373_v38, %v1130_v30  ;;  %vm421_vm8 = vmor %vm419_vm1, %vm420_vm6 }
  0xe2   : > { %v416_v2 = vsub.f32 1.0, %v415_v25  ;;  %v443_v55 = vmul.f32 %v761_v39, %v1208_v24  ;;  %v426_v16 = vor.u32 1.1754944e-38, %v425_v21  ;;  %v451_v34 = vand.u32 2147483647, %v1208_v24 }
  0xe3   : > { %v532_v41 = vmul.f32 %v1216_v10, %v521_v57  ;;  %v431_v42 = vmul.f32 %v757_v63, %v430_v49  ;;  %762 = vrcp.f32 %v1251_v46  ;;  %v453_v51 = vand.u32 2147483648, %v1208_v24 }
  0xe4   : > { %v417_v9 = vmul.f32 %v759_v13, %v416_v2  ;;  %v444_v60 = vsub.f32 1.0, %v443_v55  ;;  %v355_v61 = vsel %vm353_vm0, %v354_v35, %v352_v53  ;;  %vm448_vm9 = vweird.f32 %v761_v39 }
  0xe5   : > { %v544_v54 = vadd.f32 %v1233_v14, %v532_v41  ;;  %v432_v58 = vadd.f32 %v757_v63, %v431_v42  ;;  %v1277_v26 = vadd.f32 1e-06, %v355_v61  ;;  %v1279_v6 = vmax.f32 %v287_v50, 0.0 }
  0xe6   : > { %v418_v59 = vadd.f32 %v759_v13, %v417_v9  ;;  %v445_v35 = vmul.f32 %v761_v39, %v444_v60  ;;  %v376_v11 = vsel %vm375_vm3, %v1130_v30, %v374_v56  ;;  %v378_v50 = vand.u32 2147483648, %v1130_v30 }
  0xe7   : > { %552 = vst [vmem:[%s1271_s6] sm:$0xff] %v544_v54  ;;  %v436_v62 = vsel %vm435_vm7, %v757_v63, %v432_v58  ;;  %764 = vrcp.f32 %v1277_v26  ;;  %vm447_vm10 = vweird.f32 %v1208_v24  ;;  %vm377_vm11 = vcmp.eq.f32.partialorder %v1130_v30, 0.0 }
  0xe8   : > { %v441_v47 = vsel %vm1224_vm2, %v440_v23, %v436_v62  ;;  %v422_v17 = vsel %vm421_vm8, %v759_v13, %v418_v59  ;;  %v446_v40 = vadd.f32 %v761_v39, %v445_v35  ;;  %vm449_vm12 = vmor %vm447_vm10, %vm448_vm9  ;;  %v454_v28 = vor.u32 1.1754944e-38, %v453_v51 }
  0xe9   : > { %v523_v63 = vmul.f32 %v515_v36, %v441_v47  ;;  %v427_v27 = vsel %vm1239_vm4, %v426_v16, %v422_v17  ;;  %v763_v13 = vpop.eup %762  ;;  %v379_v36 = vsel %vm377_vm11, %v378_v50, %v376_v11  ;;  %766 = vrsqrt.f32 %v1279_v6 }
  0xea   : > { %v522_v12 = vmul.f32 %v514_v32, %v427_v27  ;;  %v450_v18 = vsel %vm449_vm12, %v761_v39, %v446_v40  ;;  %vm452_vm13 = vcmp.eq.f32.partialorder %v451_v34, 8.507059e+37  ;;  %v471_v5 = vmul.f32 %v763_v13, %v1251_v46 }
  0xeb   : > { %v534_v1 = vmul.f32 %v1216_v10, %v523_v63  ;;  %v455_v30 = vsel %vm452_vm13, %v454_v28, %v450_v18  ;;  %v1308_v21 = vadd.f32 1e-06, %v379_v36  ;;  %v479_v23 = vand.u32 2147483647, %v1251_v46 }
  0xec   : > { %v533_v15 = vmul.f32 %v1216_v10, %v522_v12  ;;  %v524_v24 = vmul.f32 %v516_v43, %v455_v30  ;;  %v472_v20 = vsub.f32 1.0, %v471_v5  ;;  %v481_v25 = vand.u32 2147483648, %v1251_v46 }
  0xed   : > { %v546_v31 = vadd.f32 %v1233_v14, %v534_v1  ;;  %v765_v57 = vpop.eup %764  ;;  %vm476_vm14 = vweird.f32 %v763_v13  ;;  %vm475_vm15 = vweird.f32 %v1251_v46  ;;  %768 = vrcp.f32 %v1308_v21 }
  0xee   : > { %v545_v32 = vadd.f32 %v1233_v14, %v533_v15  ;;  %v535_v33 = vmul.f32 %v1216_v10, %v524_v24  ;;  %v473_v49 = vmul.f32 %v763_v13, %v472_v20  ;;  %v457_v52 = vmul.f32 %v765_v57, %v1277_v26  ;;  %vm477_vm0 = vmor %vm475_vm15, %vm476_vm14 }
  0xef   : > { %554 = vst [vmem:[%s1271_s6 + $0x10] sm:$0xff] %v546_v31  ;;  %v767_v37 = vpop.eup %766  ;;  %vm480_vm1 = vcmp.eq.f32.partialorder %v479_v23, 8.507059e+37  ;;  %v482_v2 = vor.u32 1.1754944e-38, %v481_v25  ;;  %v465_v22 = vand.u32 2147483647, %v1277_v26  ;;  %v467_v39 = vand.u32 2147483648, %v1277_v26 }
  0xf0   : > { %553 = vst [vmem:[%s1271_s6 + $0x8] sm:$0xff] %v545_v32  ;;  %v547_v29 = vadd.f32 %v1233_v14, %v535_v33  ;;  %v474_v43 = vadd.f32 %v763_v13, %v473_v49  ;;  %v458_v38 = vsub.f32 1.0, %v457_v52  ;;  %v381_v41 = vmul.f32 %v767_v37, %v1279_v6 }
  0xf1   : > { %vm462_vm2 = vweird.f32 %v765_v57  ;;  %vm461_vm3 = vweird.f32 %v1277_v26  ;;  %v517_v56 = vsub.f32 %v1039_v0, %v1096_v44  ;;  %v468_v58 = vor.u32 1.1754944e-38, %v467_v39 }
  0xf2   : > { %v478_v42 = vsel %vm477_vm0, %v763_v13, %v474_v43  ;;  %v459_v3 = vmul.f32 %v765_v57, %v458_v38  ;;  %v382_v45 = vmul.f32 %v767_v37, %v381_v41  ;;  %555 = vst [vmem:[%s1271_s6 + $0x18] sm:$0xff] %v547_v29  ;;  %vm463_vm4 = vmor %vm461_vm3, %vm462_vm2  ;;  %vm466_vm5 = vcmp.eq.f32.partialorder %v465_v22, 8.507059e+37 }
  0xf3   : > { %v483_v46 = vsel %vm480_vm1, %v482_v2, %v478_v42  ;;  %v769_v55 = vpop.eup %768  ;;  %v495_v47 = vand.u32 2147483648, %v1308_v21  ;;  %v493_v35 = vand.u32 2147483647, %v1308_v21  ;;  %vm387_vm7 = vcmp.eq.f32.partialorder %v1279_v6, inf }
  0xf4   : > { %v526_v53 = vmul.f32 %v518_v4, %v483_v46  ;;  %v460_v54 = vadd.f32 %v765_v57, %v459_v3  ;;  %v383_v9 = vmul.f32 0.5, %v382_v45  ;;  %v485_v59 = vmul.f32 %v769_v55, %v1308_v21 }
  0xf5   : > { %vm490_vm6 = vweird.f32 %v769_v55  ;;  %vm489_vm8 = vweird.f32 %v1308_v21  ;;  %v390_v50 = vand.u32 2147483648, %v1279_v6  ;;  %v496_v12 = vor.u32 1.1754944e-38, %v495_v47 }
  0xf6   : > { %v537_v16 = vmul.f32 %v1216_v10, %v526_v53  ;;  %v464_v34 = vsel %vm463_vm4, %v765_v57, %v460_v54  ;;  %v384_v51 = vsub.f32 1.5, %v383_v9  ;;  %v486_v26 = vsub.f32 1.0, %v485_v59  ;;  %vm491_vm9 = vmor %vm489_vm8, %vm490_vm6 }
  0xf7   : > { %v469_v60 = vsel %vm466_vm5, %v468_v58, %v464_v34  ;;  %vm389_vm10 = vcmp.eq.f32.partialorder %v1279_v6, 0.0  ;;  %v519_v13 = vsub.f32 %v1061_v8, %v1100_v48  ;;  %vm494_vm11 = vcmp.eq.f32.partialorder %v493_v35, 8.507059e+37 }
  0xf8   : > { %v549_v61 = vadd.f32 %v1233_v14, %v537_v16  ;;  %v525_v62 = vmul.f32 %v517_v56, %v469_v60  ;;  %v385_v17 = vmul.f32 %v767_v37, %v384_v51  ;;  %v487_v44 = vmul.f32 %v769_v55, %v486_v26 }
  0xf9   : > { %v520_v57 = vsub.f32 %v1059_v7, %v1121_v19 }
  0xfa   : > { %v536_v0 = vmul.f32 %v1216_v10, %v525_v62  ;;  %557 = vst [vmem:[%s1271_s6 + $0x28] sm:$0xff] %v549_v61  ;;  %v386_v11 = vmul.f32 %v385_v17, %v1279_v6  ;;  %v488_v27 = vadd.f32 %v769_v55, %v487_v44 }
  0xfc   : > { %v548_v63 = vadd.f32 %v1233_v14, %v536_v0  ;;  %v388_v40 = vsel %vm387_vm7, %v1279_v6, %v386_v11  ;;  %v492_v1 = vsel %vm491_vm9, %v769_v55, %v488_v27 }
  0xfd   : > { %v391_v28 = vsel %vm389_vm10, %v390_v50, %v388_v40  ;;  %v497_v36 = vsel %vm494_vm11, %v496_v12, %v492_v1 }
  0xfe   : > { %556 = vst [vmem:[%s1271_s6 + $0x20] sm:$0xff] %v548_v63  ;;  %v399_v15 = vadd.f32 1e-06, %v391_v28  ;;  %v527_v18 = vmul.f32 %v519_v13, %v497_v36 }
 0x100   : > { %770 = vrcp.f32 %v399_v15  ;;  %v538_v5 = vmul.f32 %v1216_v10, %v527_v18  ;;  %v509_v24 = vand.u32 2147483648, %v399_v15  ;;  %v507_v48 = vand.u32 2147483647, %v399_v15 }
 0x101   : > { %vm503_vm13 = vweird.f32 %v399_v15 }
 0x102   : > { %v550_v31 = vadd.f32 %v1233_v14, %v538_v5  ;;  %v510_v21 = vor.u32 1.1754944e-38, %v509_v24  ;;  %vm508_vm15 = vcmp.eq.f32.partialorder %v507_v48, 8.507059e+37 }
 0x104   : > { %558 = vst [vmem:[%s1271_s6 + $0x30] sm:$0xff] %v550_v31 }
 0x106   : > { %v771_v30 = vpop.eup %770 }
 0x107   : > { %v499_v32 = vmul.f32 %v771_v30, %v399_v15  ;;  %vm504_vm12 = vweird.f32 %v771_v30 }
 0x108   : > { %vm505_vm14 = vmor %vm503_vm13, %vm504_vm12 }
 0x109   : > { %v500_v6 = vsub.f32 1.0, %v499_v32 }
 0x10b   : > { %v501_v8 = vmul.f32 %v771_v30, %v500_v6 }
 0x10d   : > { %v502_v20 = vadd.f32 %v771_v30, %v501_v8 }
 0x10f   : > { %v506_v23 = vsel %vm505_vm14, %v771_v30, %v502_v20 }
 0x110   : > { %v511_v25 = vsel %vm508_vm15, %v510_v21, %v506_v23 }
 0x111   : > { %v528_v33 = vmul.f32 %v520_v57, %v511_v25 }
 0x113   : > { %v539_v49 = vmul.f32 %v1216_v10, %v528_v33 }
 0x115   : > { %v551_v52 = vadd.f32 %v1233_v14, %v539_v49 }
 0x117   : > { %559 = vst [vmem:[%s1271_s6 + $0x38] sm:$0xff] %v551_v52 }
 0x118   : > { %859 = shalt.err (!%p856_p8)
}
 0x119   : > { %s907_s10 = smov 128   ;;  %s908_s28 = smov 8  }
 0x11a   : > { %683 = dma.vmem_to_hbm [thread:$0]  (%p981_p11), %s574_s29, 1024, %s576_s16, %s561_s30, %s907_s10, %s907_s10, %s908_s28  }
 0x11b PF: > { %p700_p9 = scmp.ge.s32.totalorder %s902_s15, 2  ;;  %s590_s23 = sand.u32 1, %s890_s12  }
 0x11c   : > { %s591_s26 = scalar_lea.sflag [#allocation4], %s590_s23 }
 0x11d   : > { %p694_p10 = pnand %p700_p9, %p985_p12 }
 0x11f   : > { %p695_p1 = pneg %p694_p10 }
 0x121   : > { %885 = dma.done.wait (%p695_p1), %s591_s26, 1024  }
 0x122   : > { %887 = vsyncadd (%p695_p1), %s591_s26, 4294966272  ;;  %p17_p0 = scmp.ge.s32.totalorder %s954_s18, 6   ;;  %s1402_s12 = smov %s894_s13 }
 0x123   : > { %s1403_s13 = smov %s898_s14  ;;  %s1404_s14 = smov %s966_s21 }
 0x124   : > { %s1405_s15 = smov %s954_s18  ;;  %19 = sbr.rel (!%p17_p0) target bundleno = 6 (0x6), region = 81 }
 0x129   :  { %597 = vsyncpa [#allocation3], 1 }
 0x12a   :  { %599 = vsyncpa [#allocation3 + $0x1], 1 }
 0x12b   :  { %600 = vsyncpa [#allocation6], 1 }
 0x12c   :  { %601 = vsyncpa [#allocation4], 1 }
 0x12d   :  { %603 = vsyncpa [#allocation4 + $0x1], 1 }

</bundles_post_ra>
